<compile_context>
chip_gen: v6e
topology: v6e:2x2x1
jax: 0.10.0
libtpu: 0.0.40
codegen_flags: <defaults>
</compile_context>

<pallas_src>
import functools

import jax
import jax.numpy as jnp
from jax import lax
from jax.experimental import pallas as pl
from jax.experimental.pallas import tpu as pltpu

_LANES = 128
_CH = 8             # al_x, al_y, av_x, av_y, tl_x, tl_y, tv_x, tv_y
_MAX_TILE_S = 512   # sublane tile per grid step (512 * 128 = 64K lanes/block)


def _dynsys_kernel(state_ref, act_ref, out_ref, *, dt, friction, bounds,
                   wind, num_steps):
    """One grid block: state (8, TS, 128), action (2, TS, 128)."""
    xl, xu, yl, yu = bounds
    wx, wy = wind

    st = state_ref[...]                 # read the whole block before any write
    act_x = act_ref[0]                  # (TS, 128)
    act_y = act_ref[1]

    def wind_force(px, py):
        in_region = (px >= xl) & (px <= xu) & (py >= yl) & (py <= yu)
        return (jnp.where(in_region, wx, 0.0).astype(px.dtype),
                jnp.where(in_region, wy, 0.0).astype(px.dtype))

    def inv_norm(vx, vy, eps):
        # 1 / max(||v||, eps) == rsqrt(max(||v||^2, eps^2))   (EUP slot)
        s = vx * vx + vy * vy
        return lax.rsqrt(jnp.maximum(s, eps * eps))

    def step(carry):
        alx, aly, avx, avy, tlx, tly, tvx, tvy = carry

        # ---- agent ----
        wax, way = wind_force(alx, aly)
        fr_a = friction * inv_norm(avx, avy, 1e-6)
        fax = wax - avx * fr_a + act_x
        fay = way - avy * fr_a + act_y
        n_avx = avx + fax * dt
        n_avy = avy + fay * dt
        n_alx = alx + avx * dt
        n_aly = aly + avy * dt

        # ---- target ----
        # TODO(synk): host-side np.random random-force injection
        # (random_force_probability defaults to 0.0) is not reproducible in a
        # TPU kernel; omitted.
        wtx, wty = wind_force(tlx, tly)
        fr_t = friction * inv_norm(tvx, tvy, 1e-12)
        ftx = wtx - tvx * fr_t
        fty = wty - tvy * fr_t
        n_tvx = tvx + ftx * dt
        n_tvy = tvy + fty * dt
        n_tlx = tlx + tvx * dt
        n_tly = tly + tvy * dt

        return (n_alx, n_aly, n_avx, n_avy, n_tlx, n_tly, n_tvx, n_tvy)

    carry = tuple(st[c] for c in range(_CH))      # 8 dense (TS, 128) tiles
    if num_steps <= 8:
        for _ in range(num_steps):                # fully unrolled short rollout
            carry = step(carry)
    else:
        carry = lax.fori_loop(0, num_steps, lambda _, c: step(c), carry,
                              unroll=4)

    out_ref[...] = jnp.stack(carry, axis=0)       # one dense (8, TS, 128) store


@functools.lru_cache(maxsize=None)
def _build_step_fn(S, TS, dt, friction, bounds, wind, num_steps):
    kernel = functools.partial(
        _dynsys_kernel, dt=dt, friction=friction, bounds=bounds, wind=wind,
        num_steps=num_steps)
    n_blk = S // TS
    pcall = pl.pallas_call(
        kernel,
        out_shape=jax.ShapeDtypeStruct((_CH, S, _LANES), jnp.float32),
        grid=(n_blk,),
        in_specs=[pl.BlockSpec((_CH, TS, _LANES), lambda i: (0, i, 0)),
                  pl.BlockSpec((2, TS, _LANES), lambda i: (0, i, 0))],
        out_specs=pl.BlockSpec((_CH, TS, _LANES), lambda i: (0, i, 0)),
        input_output_aliases={0: 0},      # state slab buffer reused as output
        compiler_params=pltpu.CompilerParams(
            dimension_semantics=("parallel",)),   # v7x: batch split across TCs
    )
    # Donate the state slab so the alias is a true in-place update (no copy).
    return jax.jit(pcall, donate_argnums=(0,))


def dynamical_system_step(state, action, *, dt=0.1, size=5,
                          friction_coefficient=0.1,
                          wind_gust=(0.0, 0.0),
                          wind_gust_region=((0.25, 0.75), (0.25, 0.75)),
                          num_steps=1):
    """One (or num_steps) DynamicalSystem.forward step(s) on TPU.

    For long rollouts, prefer a large num_steps: the slab relayout below is
    done once per launch, not once per physics step.
    """
    al = jnp.asarray(state['agent_location'], jnp.float32)
    av = jnp.asarray(state['agent_velocity'], jnp.float32)
    tl = jnp.asarray(state['target_location'], jnp.float32)
    tv = jnp.asarray(state['target_velocity'], jnp.float32)
    act = jnp.asarray(action, jnp.float32)
    B = al.shape[0]

    # Pack the batch onto (sublane, lane): each channel -> dense (S, 128).
    S = max(8, -(-B // _LANES))
    S = -(-S // 8) * 8
    if S <= _MAX_TILE_S:
        TS = S
    else:
        TS = _MAX_TILE_S
        S = -(-S // TS) * TS
    Bp = S * _LANES

    state_slab = jnp.concatenate([al.T, av.T, tl.T, tv.T], axis=0)  # (8, B)
    state_slab = jnp.pad(state_slab, ((0, 0), (0, Bp - B)))
    state_slab = state_slab.reshape(_CH, S, _LANES)
    act_slab = jnp.pad(act.T, ((0, 0), (0, Bp - B))).reshape(2, S, _LANES)

    bounds = (float(wind_gust_region[0][0] * size),
              float(wind_gust_region[0][1] * size),
              float(wind_gust_region[1][0] * size),
              float(wind_gust_region[1][1] * size))

    step_fn = _build_step_fn(S, TS, float(dt), float(friction_coefficient),
                             bounds,
                             (float(wind_gust[0]), float(wind_gust[1])),
                             int(num_steps))
    out_slab = step_fn(state_slab, act_slab)

    out = out_slab.reshape(_CH, Bp)[:, :B]
    return dict(agent_location=out[0:2].T, agent_velocity=out[2:4].T,
                target_location=out[4:6].T, target_velocity=out[6:8].T)


def _reference(state, action, *, dt=0.1, size=5, friction=0.1,
               wind_gust=(0.0, 0.0),
               wind_gust_region=((0.25, 0.75), (0.25, 0.75))):
    """Pure-JAX reference mirroring the PyTorch forward (one step)."""
    bounds = (wind_gust_region[0][0] * size, wind_gust_region[0][1] * size,
              wind_gust_region[1][0] * size, wind_gust_region[1][1] * size)
    wind = jnp.asarray(wind_gust, jnp.float32)

    def mask(loc):
        x, y = loc[..., 0], loc[..., 1]
        m = ((x >= bounds[0]) & (x <= bounds[1]) &
             (y >= bounds[2]) & (y <= bounds[3]))
        return m.astype(loc.dtype)[..., None]

    def normalize(v, eps):
        n = jnp.linalg.norm(v, axis=-1, keepdims=True)
        return v / jnp.maximum(n, eps)

    al, av = state['agent_location'], state['agent_velocity']
    tl, tv = state['target_location'], state['target_velocity']

    fa = wind * mask(al) - friction * normalize(av, 1e-6) + action
    ft = wind * mask(tl) - friction * normalize(tv, 1e-12)
    return dict(agent_location=al + av * dt, agent_velocity=av + fa * dt,
                target_location=tl + tv * dt, target_velocity=tv + ft * dt)


if __name__ == "__main__":
    key = jax.random.PRNGKey(0)
    k1, k2, k3, k4, k5 = jax.random.split(key, 5)
    B, SIZE = 8, 5

    state = dict(
        agent_location=jax.random.uniform(k1, (B, 2), jnp.float32, 0.0, SIZE),
        agent_velocity=jax.random.normal(k2, (B, 2), jnp.float32) * 0.5,
        target_location=jax.random.uniform(k3, (B, 2), jnp.float32, 0.0, SIZE),
        target_velocity=jax.random.normal(k4, (B, 2), jnp.float32) * 0.5,
    )
    action = jax.random.normal(k5, (B, 2), jnp.float32) * 0.1
    wind = (0.05, -0.02)

    # ---- single step vs. reference ----
    out = dynamical_system_step(state, action, dt=0.1, size=SIZE,
                                friction_coefficient=0.1, wind_gust=wind)
    jax.block_until_ready(out)
    ref = _reference(state, action, dt=0.1, size=SIZE, friction=0.1,
                     wind_gust=wind)
    for k in out:
        assert jnp.allclose(out[k], ref[k], atol=1e-5, rtol=1e-5), k

    # ---- short in-kernel rollout (fully unrolled path) ----
    T = 4
    out_T = dynamical_system_step(state, action, dt=0.1, size=SIZE,
                                  friction_coefficient=0.1, wind_gust=wind,
                                  num_steps=T)
    jax.block_until_ready(out_T)
    ref_T = dict(state)
    for _ in range(T):
        ref_T = _reference(ref_T, action, dt=0.1, size=SIZE, friction=0.1,
                           wind_gust=wind)
    for k in out_T:
        assert jnp.allclose(out_T[k], ref_T[k], atol=1e-4, rtol=1e-4), k

    # ---- longer in-kernel rollout (fori_loop path) ----
    T2 = 12
    out_T2 = dynamical_system_step(state, action, dt=0.1, size=SIZE,
                                   friction_coefficient=0.1, wind_gust=wind,
                                   num_steps=T2)
    jax.block_until_ready(out_T2)
    ref_T2 = dict(state)
    for _ in range(T2):
        ref_T2 = _reference(ref_T2, action, dt=0.1, size=SIZE, friction=0.1,
                            wind_gust=wind)
    for k in out_T2:
        assert jnp.allclose(out_T2[k], ref_T2[k], atol=1e-4, rtol=1e-4), k

    print("KERNEL_OK")
</pallas_src>

<mosaic_0001>
module attributes {stable_mosaic.version = 11 : i64} {
  func.func @_dynsys_kernel(%arg0: i32, %arg1: memref<8x8x128xf32, #tpu.memory_space<vmem>>, %arg2: memref<2x8x128xf32, #tpu.memory_space<vmem>>, %arg3: memref<8x8x128xf32, #tpu.memory_space<vmem>>) attributes {dimension_semantics = [#tpu.dimension_semantics<parallel>], iteration_bounds = array<i64: 1>, scalar_prefetch = 0 : i64, scratch_operands = 0 : i64, tpu.core_type = #tpu.core_type<tc>, window_params = [{transform_indices = @transform_0, window_bounds = array<i64: 8, 8, 128>}, {transform_indices = @transform_1, window_bounds = array<i64: 2, 8, 128>}, {transform_indices = @transform_2, window_bounds = array<i64: 8, 8, 128>}]} {
    %c0 = arith.constant 0 : index
    %c0_0 = arith.constant 0 : index
    %c0_1 = arith.constant 0 : index
    %0 = vector.load %arg1[%c0, %c0_0, %c0_1] : memref<8x8x128xf32, #tpu.memory_space<vmem>>, vector<8x8x128xf32>
    %c0_2 = arith.constant 0 : index
    %c0_3 = arith.constant 0 : index
    %c0_4 = arith.constant 0 : index
    %1 = vector.load %arg2[%c0_2, %c0_3, %c0_4] : memref<2x8x128xf32, #tpu.memory_space<vmem>>, vector<1x8x128xf32>
    %2 = vector.shape_cast %1 : vector<1x8x128xf32> to vector<8x128xf32>
    %c1 = arith.constant 1 : index
    %c0_5 = arith.constant 0 : index
    %c0_6 = arith.constant 0 : index
    %3 = vector.load %arg2[%c1, %c0_5, %c0_6] : memref<2x8x128xf32, #tpu.memory_space<vmem>>, vector<1x8x128xf32>
    %4 = vector.shape_cast %3 : vector<1x8x128xf32> to vector<8x128xf32>
    %5 = vector.extract_strided_slice %0 {offsets = [0, 0, 0], sizes = [1, 8, 128], strides = [1, 1, 1]} : vector<8x8x128xf32> to vector<1x8x128xf32>
    %6 = vector.shape_cast %5 : vector<1x8x128xf32> to vector<8x128xf32>
    %7 = vector.extract_strided_slice %0 {offsets = [1, 0, 0], sizes = [1, 8, 128], strides = [1, 1, 1]} : vector<8x8x128xf32> to vector<1x8x128xf32>
    %8 = vector.shape_cast %7 : vector<1x8x128xf32> to vector<8x128xf32>
    %9 = vector.extract_strided_slice %0 {offsets = [2, 0, 0], sizes = [1, 8, 128], strides = [1, 1, 1]} : vector<8x8x128xf32> to vector<1x8x128xf32>
    %10 = vector.shape_cast %9 : vector<1x8x128xf32> to vector<8x128xf32>
    %11 = vector.extract_strided_slice %0 {offsets = [3, 0, 0], sizes = [1, 8, 128], strides = [1, 1, 1]} : vector<8x8x128xf32> to vector<1x8x128xf32>
    %12 = vector.shape_cast %11 : vector<1x8x128xf32> to vector<8x128xf32>
    %13 = vector.extract_strided_slice %0 {offsets = [4, 0, 0], sizes = [1, 8, 128], strides = [1, 1, 1]} : vector<8x8x128xf32> to vector<1x8x128xf32>
    %14 = vector.shape_cast %13 : vector<1x8x128xf32> to vector<8x128xf32>
    %15 = vector.extract_strided_slice %0 {offsets = [5, 0, 0], sizes = [1, 8, 128], strides = [1, 1, 1]} : vector<8x8x128xf32> to vector<1x8x128xf32>
    %16 = vector.shape_cast %15 : vector<1x8x128xf32> to vector<8x128xf32>
    %17 = vector.extract_strided_slice %0 {offsets = [6, 0, 0], sizes = [1, 8, 128], strides = [1, 1, 1]} : vector<8x8x128xf32> to vector<1x8x128xf32>
    %18 = vector.shape_cast %17 : vector<1x8x128xf32> to vector<8x128xf32>
    %19 = vector.extract_strided_slice %0 {offsets = [7, 0, 0], sizes = [1, 8, 128], strides = [1, 1, 1]} : vector<8x8x128xf32> to vector<1x8x128xf32>
    %20 = vector.shape_cast %19 : vector<1x8x128xf32> to vector<8x128xf32>
    %cst = arith.constant 1.250000e+00 : f32
    %21 = vector.broadcast %cst : f32 to vector<8x128xf32>
    %22 = arith.cmpf oge, %6, %21 : vector<8x128xf32>
    %cst_7 = arith.constant 3.750000e+00 : f32
    %23 = vector.broadcast %cst_7 : f32 to vector<8x128xf32>
    %24 = arith.cmpf ole, %6, %23 : vector<8x128xf32>
    %25 = arith.andi %22, %24 : vector<8x128xi1>
    %cst_8 = arith.constant 1.250000e+00 : f32
    %26 = vector.broadcast %cst_8 : f32 to vector<8x128xf32>
    %27 = arith.cmpf oge, %8, %26 : vector<8x128xf32>
    %28 = arith.andi %25, %27 : vector<8x128xi1>
    %cst_9 = arith.constant 3.750000e+00 : f32
    %29 = vector.broadcast %cst_9 : f32 to vector<8x128xf32>
    %30 = arith.cmpf ole, %8, %29 : vector<8x128xf32>
    %31 = arith.andi %28, %30 : vector<8x128xi1>
    %cst_10 = arith.constant 5.000000e-02 : f32
    %cst_11 = arith.constant 0.000000e+00 : f32
    %32 = vector.broadcast %cst_10 : f32 to vector<8x128xf32>
    %33 = vector.broadcast %cst_11 : f32 to vector<8x128xf32>
    %34 = arith.select %31, %32, %33 : vector<8x128xi1>, vector<8x128xf32>
    %cst_12 = arith.constant -2.000000e-02 : f32
    %cst_13 = arith.constant 0.000000e+00 : f32
    %35 = vector.broadcast %cst_12 : f32 to vector<8x128xf32>
    %36 = vector.broadcast %cst_13 : f32 to vector<8x128xf32>
    %37 = arith.select %31, %35, %36 : vector<8x128xi1>, vector<8x128xf32>
    %38 = arith.mulf %10, %10 : vector<8x128xf32>
    %39 = arith.mulf %12, %12 : vector<8x128xf32>
    %40 = arith.addf %38, %39 : vector<8x128xf32>
    %cst_14 = arith.constant 9.99999996E-13 : f32
    %41 = vector.broadcast %cst_14 : f32 to vector<8x128xf32>
    %42 = arith.maximumf %40, %41 : vector<8x128xf32>
    %43 = math.rsqrt %42 : vector<8x128xf32>
    %cst_15 = arith.constant 1.000000e-01 : f32
    %44 = vector.broadcast %cst_15 : f32 to vector<8x128xf32>
    %45 = arith.mulf %44, %43 : vector<8x128xf32>
    %46 = arith.mulf %10, %45 : vector<8x128xf32>
    %47 = arith.subf %34, %46 : vector<8x128xf32>
    %48 = arith.addf %47, %2 : vector<8x128xf32>
    %49 = arith.mulf %12, %45 : vector<8x128xf32>
    %50 = arith.subf %37, %49 : vector<8x128xf32>
    %51 = arith.addf %50, %4 : vector<8x128xf32>
    %cst_16 = arith.constant 1.000000e-01 : f32
    %52 = vector.broadcast %cst_16 : f32 to vector<8x128xf32>
    %53 = arith.mulf %48, %52 : vector<8x128xf32>
    %54 = arith.addf %10, %53 : vector<8x128xf32>
    %cst_17 = arith.constant 1.000000e-01 : f32
    %55 = vector.broadcast %cst_17 : f32 to vector<8x128xf32>
    %56 = arith.mulf %51, %55 : vector<8x128xf32>
    %57 = arith.addf %12, %56 : vector<8x128xf32>
    %cst_18 = arith.constant 1.000000e-01 : f32
    %58 = vector.broadcast %cst_18 : f32 to vector<8x128xf32>
    %59 = arith.mulf %10, %58 : vector<8x128xf32>
    %60 = arith.addf %6, %59 : vector<8x128xf32>
    %cst_19 = arith.constant 1.000000e-01 : f32
    %61 = vector.broadcast %cst_19 : f32 to vector<8x128xf32>
    %62 = arith.mulf %12, %61 : vector<8x128xf32>
    %63 = arith.addf %8, %62 : vector<8x128xf32>
    %cst_20 = arith.constant 1.250000e+00 : f32
    %64 = vector.broadcast %cst_20 : f32 to vector<8x128xf32>
    %65 = arith.cmpf oge, %14, %64 : vector<8x128xf32>
    %cst_21 = arith.constant 3.750000e+00 : f32
    %66 = vector.broadcast %cst_21 : f32 to vector<8x128xf32>
    %67 = arith.cmpf ole, %14, %66 : vector<8x128xf32>
    %68 = arith.andi %65, %67 : vector<8x128xi1>
    %cst_22 = arith.constant 1.250000e+00 : f32
    %69 = vector.broadcast %cst_22 : f32 to vector<8x128xf32>
    %70 = arith.cmpf oge, %16, %69 : vector<8x128xf32>
    %71 = arith.andi %68, %70 : vector<8x128xi1>
    %cst_23 = arith.constant 3.750000e+00 : f32
    %72 = vector.broadcast %cst_23 : f32 to vector<8x128xf32>
    %73 = arith.cmpf ole, %16, %72 : vector<8x128xf32>
    %74 = arith.andi %71, %73 : vector<8x128xi1>
    %cst_24 = arith.constant 5.000000e-02 : f32
    %cst_25 = arith.constant 0.000000e+00 : f32
    %75 = vector.broadcast %cst_24 : f32 to vector<8x128xf32>
    %76 = vector.broadcast %cst_25 : f32 to vector<8x128xf32>
    %77 = arith.select %74, %75, %76 : vector<8x128xi1>, vector<8x128xf32>
    %cst_26 = arith.constant -2.000000e-02 : f32
    %cst_27 = arith.constant 0.000000e+00 : f32
    %78 = vector.broadcast %cst_26 : f32 to vector<8x128xf32>
    %79 = vector.broadcast %cst_27 : f32 to vector<8x128xf32>
    %80 = arith.select %74, %78, %79 : vector<8x128xi1>, vector<8x128xf32>
    %81 = arith.mulf %18, %18 : vector<8x128xf32>
    %82 = arith.mulf %20, %20 : vector<8x128xf32>
    %83 = arith.addf %81, %82 : vector<8x128xf32>
    %cst_28 = arith.constant 1.000000e-24 : f32
    %84 = vector.broadcast %cst_28 : f32 to vector<8x128xf32>
    %85 = arith.maximumf %83, %84 : vector<8x128xf32>
    %86 = math.rsqrt %85 : vector<8x128xf32>
    %cst_29 = arith.constant 1.000000e-01 : f32
    %87 = vector.broadcast %cst_29 : f32 to vector<8x128xf32>
    %88 = arith.mulf %87, %86 : vector<8x128xf32>
    %89 = arith.mulf %18, %88 : vector<8x128xf32>
    %90 = arith.subf %77, %89 : vector<8x128xf32>
    %91 = arith.mulf %20, %88 : vector<8x128xf32>
    %92 = arith.subf %80, %91 : vector<8x128xf32>
    %cst_30 = arith.constant 1.000000e-01 : f32
    %93 = vector.broadcast %cst_30 : f32 to vector<8x128xf32>
    %94 = arith.mulf %90, %93 : vector<8x128xf32>
    %95 = arith.addf %18, %94 : vector<8x128xf32>
    %cst_31 = arith.constant 1.000000e-01 : f32
    %96 = vector.broadcast %cst_31 : f32 to vector<8x128xf32>
    %97 = arith.mulf %92, %96 : vector<8x128xf32>
    %98 = arith.addf %20, %97 : vector<8x128xf32>
    %cst_32 = arith.constant 1.000000e-01 : f32
    %99 = vector.broadcast %cst_32 : f32 to vector<8x128xf32>
    %100 = arith.mulf %18, %99 : vector<8x128xf32>
    %101 = arith.addf %14, %100 : vector<8x128xf32>
    %cst_33 = arith.constant 1.000000e-01 : f32
    %102 = vector.broadcast %cst_33 : f32 to vector<8x128xf32>
    %103 = arith.mulf %20, %102 : vector<8x128xf32>
    %104 = arith.addf %16, %103 : vector<8x128xf32>
    %105 = vector.shape_cast %60 : vector<8x128xf32> to vector<1x8x128xf32>
    %106 = vector.shape_cast %63 : vector<8x128xf32> to vector<1x8x128xf32>
    %107 = vector.shape_cast %54 : vector<8x128xf32> to vector<1x8x128xf32>
    %108 = vector.shape_cast %57 : vector<8x128xf32> to vector<1x8x128xf32>
    %109 = vector.shape_cast %101 : vector<8x128xf32> to vector<1x8x128xf32>
    %110 = vector.shape_cast %104 : vector<8x128xf32> to vector<1x8x128xf32>
    %111 = vector.shape_cast %95 : vector<8x128xf32> to vector<1x8x128xf32>
    %112 = vector.shape_cast %98 : vector<8x128xf32> to vector<1x8x128xf32>
    %113 = tpu.concatenate %105, %106, %107, %108, %109, %110, %111, %112 in 0 : vector<1x8x128xf32>, vector<1x8x128xf32>, vector<1x8x128xf32>, vector<1x8x128xf32>, vector<1x8x128xf32>, vector<1x8x128xf32>, vector<1x8x128xf32>, vector<1x8x128xf32> -> vector<8x8x128xf32>
    %c0_34 = arith.constant 0 : index
    %c0_35 = arith.constant 0 : index
    %c0_36 = arith.constant 0 : index
    %114 = vector.load %arg3[%c0_34, %c0_35, %c0_36] : memref<8x8x128xf32, #tpu.memory_space<vmem>>, vector<8x8x128xf32>
    tpu.vector_store %arg3[%c0_34, %c0_35, %c0_36], %113 {strides = array<i32>} : memref<8x8x128xf32, #tpu.memory_space<vmem>>, vector<8x8x128xf32>,
    return
  }
  func.func @transform_0(%arg0: i32) -> (i32, i32, i32) {
    %c0_i32 = arith.constant 0 : i32
    %c0_i32_0 = arith.constant 0 : i32
    %c0_i32_1 = arith.constant 0 : i32
    return %c0_i32, %arg0, %c0_i32_0 : i32, i32, i32
  }
  func.func @transform_1(%arg0: i32) -> (i32, i32, i32) {
    %c0_i32 = arith.constant 0 : i32
    %c0_i32_0 = arith.constant 0 : i32
    %c0_i32_1 = arith.constant 0 : i32
    return %c0_i32, %arg0, %c0_i32_0 : i32, i32, i32
  }
  func.func @transform_2(%arg0: i32) -> (i32, i32, i32) {
    %c0_i32 = arith.constant 0 : i32
    %c0_i32_0 = arith.constant 0 : i32
    %c0_i32_1 = arith.constant 0 : i32
    return %c0_i32, %arg0, %c0_i32_0 : i32, i32, i32
  }
}

</mosaic_0001>

<bundles_post_ra>
// kernel: tpu_custom_call.1
= control target key start
LH: loop header
LB: loop body
LE: loop exit
PB: predicated region body
PF: predicated region fallthrough
CT: control target
= control target key end

     0   :  { %7 = vsyncpa [#allocation3], 0  ;;  %s269_s0 = inlined_call_operand.hbm [shape: f32[8,8,128], index: 0, kind: input, shape index: {}, may-alias: {0,2}]   ;;  %s270_s1 = inlined_call_operand.hbm [shape: f32[2,8,128], index: 1, kind: input, shape index: {}]   ;;  %s271_s2 = inlined_call_operand.hbm [shape: f32[8,8,128], index: 2, kind: output, shape index: {}, may-alias: {0,2}]  }
   0x1   :  { %8 = vsyncpa [#allocation6], 0 }
   0x2   :  { %9 = vsyncpa [#allocation4], 0  ;;  %s209_s9 = smov [#allocation2]  }
   0x3   :  { %s15_s10 = sshll.u32 %s209_s9, 4  ;;  %s16_s10 = int_to_ptr.vmem [resolvable:$true] %s15_s10 }
   0x4   :  { %s151_s11 = scalar_lea.vmem %s16_s10, 1024  ;;  %p156_p1 = scmp.lt.s32.totalorder %s16_s10, %s16_s10 }
   0x5   :  { %p152_p0 = scmp.ne.s32.totalorder %s16_s10, %s151_s11  ;;  %p157_p2 = scmp.lt.s32.totalorder %s151_s11, %s151_s11 }
   0x7   :  { %p158_p3 = por %p157_p2, %p156_p1 }
   0x9   :  { %p159_p4 = pnand %p158_p3, %p152_p0 }
   0xb   :  { %162 = shalt.err (!%p159_p4)
}
   0xc   :  { %s210_s12 = smov 128   ;;  %s211_s13 = smov 8  }
   0xd   :  { %21 = dma.hbm_to_vmem [thread:$0]  %s269_s0, 1024, %s16_s10, [#allocation3], %s210_s12, %s210_s12, %s211_s13  }
   0xe   :  { %s212_s16 = smov [#allocation5]  }
   0xf   :  { %s27_s17 = sshll.u32 %s212_s16, 4  ;;  %s28_s17 = int_to_ptr.vmem [resolvable:$true] %s27_s17 }
  0x10   :  { %s171_s18 = scalar_lea.vmem %s28_s17, 256  ;;  %p176_p6 = scmp.lt.s32.totalorder %s28_s17, %s28_s17 }
  0x11   :  { %p172_p5 = scmp.ne.s32.totalorder %s28_s17, %s171_s18  ;;  %p177_p7 = scmp.lt.s32.totalorder %s171_s18, %s171_s18 }
  0x13   :  { %p178_p8 = por %p177_p7, %p176_p6 }
  0x15   :  { %p179_p9 = pnand %p178_p8, %p172_p5 }
  0x17   :  { %182 = shalt.err (!%p179_p9)
}
  0x18   :  { %33 = dma.hbm_to_vmem [thread:$0]  %s270_s1, 256, %s28_s17, [#allocation6], %s210_s12, %s210_s12, %s211_s13  }
  0x19   :  { %203 = dma.done.wait [#allocation3], 1024  }
  0x1a   :  { %204 = vsyncadd [#allocation3], 4294966272 }
  0x1b   :  { %205 = dma.done.wait [#allocation6], 256  }
  0x1c   :  { %206 = vsyncadd [#allocation6], 4294967040  ;;  %v242_v0 = vld [vmem:[#allocation2 + $0x10] sm:$0xff]  ;;  %v247_v3 = vld [vmem:[#allocation2 + $0x18] sm:$0xff]  ;;  %v213_v26 = vmov 0.0   ;;  %s214_s0 = smov [#allocation7]  }
  0x1d   :  { %v60_v1 = vmul.f32 %v242_v0, %v242_v0  ;;  %v76_v2 = vmul.f32 0.1, %v242_v0  ;;  %v40_v4 = vld [vmem:[#allocation2] sm:$0xff]  ;;  %v61_v5 = vmul.f32 %v247_v3, %v247_v3  ;;  %v78_v6 = vmul.f32 0.1, %v247_v3  ;;  %v41_v8 = vld [vmem:[#allocation2 + $0x8] sm:$0xff] }
  0x1e   :  { %v252_v9 = vld [vmem:[#allocation2 + $0x30] sm:$0xff]  ;;  %v47_v14 = vld [vmem:[#allocation2 + $0x38] sm:$0xff]  ;;  %v44_v15 = vld [vmem:[#allocation2 + $0x20] sm:$0xff]  ;;  %vm51_vm0 = vcmp.ge.f32.partialorder %v40_v4, 1.25  ;;  %vm52_vm1 = vcmp.le.f32.partialorder %v40_v4, 3.75  ;;  %vm54_vm3 = vcmp.ge.f32.partialorder %v41_v8, 1.25 }
  0x1f   :  { %v77_v7 = vadd.f32 %v76_v2, %v40_v4  ;;  %v62_v10 = vadd.f32 %v61_v5, %v60_v1  ;;  %v79_v11 = vadd.f32 %v78_v6, %v41_v8  ;;  %v89_v12 = vmul.f32 %v252_v9, %v252_v9  ;;  %v45_v20 = vld [vmem:[#allocation2 + $0x28] sm:$0xff]  ;;  %vm53_vm2 = vmand %vm51_vm0, %vm52_vm1  ;;  %v48_v32 = vld [vmem:[#allocation5] sm:$0xff]  ;;  %s120_s1 = sshll.u32 %s214_s0, 4  ;;  %s121_s1 = int_to_ptr.vmem [resolvable:$true] %s120_s1 }
  0x20   :  { %v103_v13 = vmul.f32 0.1, %v252_v9  ;;  %v90_v18 = vmul.f32 %v47_v14, %v47_v14  ;;  %v105_v19 = vmul.f32 0.1, %v47_v14  ;;  %vm80_vm4 = vcmp.ge.f32.partialorder %v44_v15, 1.25  ;;  %vm55_vm6 = vmand %vm53_vm2, %vm54_vm3  ;;  %v50_v33 = vld [vmem:[#allocation5 + $0x8] sm:$0xff]  ;;  %p188_p11 = scmp.lt.s32.totalorder %s121_s1, %s121_s1 }
  0x21   :  { %107 = vst [vmem:[#allocation7] sm:$0xff] %v77_v7  ;;  %108 = vst [vmem:[#allocation7 + $0x8] sm:$0xff] %v79_v11  ;;  %v63_v16 = vmax.f32 %v62_v10, 1e-12  ;;  %vm81_vm5 = vcmp.le.f32.partialorder %v44_v15, 3.75  ;;  %vm56_vm7 = vcmp.le.f32.partialorder %v41_v8, 3.75 }
  0x22   :  { %v104_v17 = vadd.f32 %v103_v13, %v44_v15  ;;  %v106_v21 = vadd.f32 %v105_v19, %v45_v20  ;;  %v91_v22 = vadd.f32 %v90_v18, %v89_v12  ;;  %vm82_vm8 = vmand %vm80_vm4, %vm81_vm5  ;;  %vm83_vm9 = vcmp.ge.f32.partialorder %v45_v20, 1.25  ;;  %s183_s21 = scalar_lea.vmem %s121_s1, 1024 }
  0x23   :  { %139 = vrsqrt.f32 %v63_v16  ;;  %vm57_vm10 = vmand %vm55_vm6, %vm56_vm7  ;;  %vm85_vm11 = vcmp.le.f32.partialorder %v45_v20, 3.75  ;;  %p184_p10 = scmp.ne.s32.totalorder %s121_s1, %s183_s21  ;;  %p189_p12 = scmp.lt.s32.totalorder %s183_s21, %s183_s21 }
  0x24   :  { %111 = vst [vmem:[#allocation7 + $0x20] sm:$0xff] %v104_v17  ;;  %112 = vst [vmem:[#allocation7 + $0x28] sm:$0xff] %v106_v21  ;;  %v92_v23 = vmax.f32 %v91_v22, 1e-24  ;;  %v58_v27 = vsel %vm57_vm10, 0.05, %v213_v26 }
  0x25   :  { %vm84_vm12 = vmand %vm82_vm8, %vm83_vm9  ;;  %v59_v28 = vsel %vm57_vm10, -0.02, %v213_v26  ;;  %p190_p13 = por %p189_p12, %p188_p11 }
  0x26   :  { %141 = vrsqrt.f32 %v92_v23  ;;  %vm86_vm13 = vmand %vm84_vm12, %vm85_vm11 }
  0x27   :  { %v87_v37 = vsel %vm86_vm13, 0.05, %v213_v26  ;;  %v88_v38 = vsel %vm86_vm13, -0.02, %v213_v26  ;;  %p191_p0 = pnand %p190_p13, %p184_p10 }
  0x30   :  { %v140_v24 = vpop.eup %139 }
  0x31   :  { %v65_v25 = vmul.f32 0.1, %v140_v24 }
  0x33   :  { %v66_v29 = vmul.f32 %v65_v25, %v242_v0  ;;  %v69_v30 = vmul.f32 %v65_v25, %v247_v3  ;;  %v142_v31 = vpop.eup %141 }
  0x34   :  { %v94_v36 = vmul.f32 0.1, %v142_v31 }
  0x35   :  { %v67_v34 = vsub.f32 %v58_v27, %v66_v29  ;;  %v70_v35 = vsub.f32 %v59_v28, %v69_v30 }
  0x36   :  { %v95_v41 = vmul.f32 %v94_v36, %v252_v9  ;;  %v97_v42 = vmul.f32 %v94_v36, %v47_v14 }
  0x37   :  { %v68_v39 = vadd.f32 %v67_v34, %v48_v32  ;;  %v71_v40 = vadd.f32 %v70_v35, %v50_v33 }
  0x38   :  { %v96_v45 = vsub.f32 %v87_v37, %v95_v41  ;;  %v98_v46 = vsub.f32 %v88_v38, %v97_v42 }
  0x39   :  { %v72_v43 = vmul.f32 0.1, %v68_v39  ;;  %v74_v44 = vmul.f32 0.1, %v71_v40 }
  0x3a   :  { %v99_v49 = vmul.f32 0.1, %v96_v45  ;;  %v101_v50 = vmul.f32 0.1, %v98_v46 }
  0x3b   :  { %v73_v47 = vadd.f32 %v72_v43, %v242_v0  ;;  %v75_v48 = vadd.f32 %v74_v44, %v247_v3 }
  0x3c   :  { %v100_v51 = vadd.f32 %v99_v49, %v252_v9  ;;  %v102_v52 = vadd.f32 %v101_v50, %v47_v14 }
  0x3d   :  { %109 = vst [vmem:[#allocation7 + $0x10] sm:$0xff] %v73_v47  ;;  %110 = vst [vmem:[#allocation7 + $0x18] sm:$0xff] %v75_v48 }
  0x3e   :  { %113 = vst [vmem:[#allocation7 + $0x30] sm:$0xff] %v100_v51  ;;  %114 = vst [vmem:[#allocation7 + $0x38] sm:$0xff] %v102_v52 }
  0x3f   :  { %194 = shalt.err (!%p191_p0)
}
  0x40   :  { %126 = dma.vmem_to_hbm [thread:$0]  %s121_s1, 1024, %s271_s2, [#allocation4], %s210_s12, %s210_s12, %s211_s13  }
  0x41   :  { %207 = dma.done.wait [#allocation4], 1024  }
  0x42   :  { %208 = vsyncadd [#allocation4], 4294966272 }
  0x43   :  { %130 = vsyncpa [#allocation3], 1 }
  0x44   :  { %131 = vsyncpa [#allocation6], 1 }
  0x45   :  { %132 = vsyncpa [#allocation4], 1 }

</bundles_post_ra>
